<compile_context>
chip_gen: v6e
topology: v6e:2x2x1
jax: 0.10.0
libtpu: 0.0.40
codegen_flags: <defaults>
</compile_context>

<pallas_src>
import functools

import jax
import jax.numpy as jnp
from jax.experimental import pallas as pl
from jax.experimental.pallas import tpu as pltpu


# ----------------------------------------------------------------------------
# Fused kernel:
#   weights[b, h_blk] = mean_q attn[b, h_blk, :, :]      (tiled f32 reduction)
#   logits[b]         = x0[b] @ W + bias                  (once, at q == 0)
# ----------------------------------------------------------------------------
def _fused_kernel(attn_ref, x0_ref, w_ref, b_ref, w_out_ref, logits_ref, *,
                  inv_tq, tq, tq_tile, needs_mask):
    # attn_ref:   [1, nh_tile, tq_tile, Tk]
    # x0_ref:     [1, 1, H]
    # w_ref:      [H, OUT]          (resident)
    # b_ref:      [1, OUT]          (resident)
    # w_out_ref:  [1, nh_tile, Tk]  f32, resident across the q axis
    # logits_ref: [1, 1, 1, OUT]    f32
    q = pl.program_id(2)

    @pl.when(q == 0)
    def _init():
        w_out_ref[...] = jnp.zeros_like(w_out_ref)
        # Tiny classification head: native-dtype MXU matmul, f32 accumulation.
        acc = jnp.dot(x0_ref[0], w_ref[...], preferred_element_type=jnp.float32)
        logits_ref[0, 0] = (acc + b_ref[...].astype(jnp.float32)).astype(
            logits_ref.dtype)

    blk = attn_ref[0]                                # [nh_tile, tq_tile, Tk]
    if needs_mask:
        # Partial last Tq tile: zero out rows >= Tq before reducing.
        row = q * tq_tile + jax.lax.broadcasted_iota(jnp.int32, blk.shape, 1)
        blk = jnp.where(row < tq, blk, jnp.zeros_like(blk))
    # f32 accumulation without materializing the whole block in f32 vregs.
    w_out_ref[...] += jnp.sum(blk, axis=1, dtype=jnp.float32)[None]

    @pl.when(q == pl.num_programs(2) - 1)
    def _finalize():
        w_out_ref[...] = w_out_ref[...] * inv_tq     # single scale at the end


# ----------------------------------------------------------------------------
# Tiling / budget helpers
# ----------------------------------------------------------------------------
def _vmem_budget():
    """(per-block budget, physical VMEM capacity) — generation aware."""
    cap = 64 << 20
    try:
        info = pltpu.get_tpu_info()
        cap = int(getattr(info, "vmem_capacity_bytes", cap)) or cap
    except Exception:
        pass
    # ~1/16 of physical VMEM per attention block, clamped to [2 MiB, 16 MiB]:
    # v5e/v6e (128 MiB) -> 8 MiB blocks, v7x (64 MiB) -> 4 MiB blocks.
    return int(min(max(cap // 16, 2 << 20), 16 << 20)), cap


def _pick_nh_split(NH, B):
    """Split heads across 2 'parallel' blocks so both v7x TCs are fed at small
    batch; only when the half stays 8-sublane aligned (output-block layout)."""
    if B >= 4 or NH % 2 != 0:
        return 1
    return 2 if (NH // 2) % 8 == 0 else 1


def _pick_tq_tile(Tq, nh_tile, Tk, itemsize, budget_bytes):
    """Largest Tq tile fitting the budget, rounded to the dtype sublane
    multiple; returns (tile, needs_mask). Never exceeds the budget-derived
    size just to satisfy divisibility (partial last tile is masked)."""
    sub = max(8, 32 // max(1, itemsize))        # 8 f32, 16 bf16, 32 int8/fp8
    row_bytes = max(1, nh_tile * Tk * itemsize)
    max_rows = budget_bytes // row_bytes
    if max_rows >= Tq:
        return Tq, False                        # whole axis in one (legal) block
    tile = max(sub, (max_rows // sub) * sub)
    tile = min(tile, Tq)
    return tile, (Tq % tile != 0)


# ----------------------------------------------------------------------------
# pallas_call wrapper
# ----------------------------------------------------------------------------
def _fused_head(attn, x0_3d, w_t, bias_2d, block_budget_bytes=None):
    B, NH, Tq, Tk = attn.shape
    H = x0_3d.shape[-1]
    OUT = w_t.shape[-1]

    auto_budget, vmem_cap = _vmem_budget()
    budget = auto_budget if block_budget_bytes is None else int(block_budget_bytes)

    n_h = _pick_nh_split(NH, B)
    nh_tile = NH // n_h
    tq_tile, needs_mask = _pick_tq_tile(Tq, nh_tile, Tk, attn.dtype.itemsize, budget)
    n_q = pl.cdiv(Tq, tq_tile)

    kernel = functools.partial(_fused_kernel, inv_tq=1.0 / Tq, tq=Tq,
                               tq_tile=tq_tile, needs_mask=needs_mask)

    # Double-buffered attention block (x2) + margin + small resident tensors,
    # capped generation-aware (<= 3/8 of physical VMEM; v7x -> <= 24 MiB).
    attn_block_bytes = nh_tile * tq_tile * Tk * attn.dtype.itemsize
    resident_bytes = (nh_tile * Tk * 4 + OUT * 4 +
                      H * OUT * w_t.dtype.itemsize +
                      H * x0_3d.dtype.itemsize + OUT * bias_2d.dtype.itemsize)
    vmem_limit = int(min(max(4 * attn_block_bytes + 2 * resident_bytes + (4 << 20),
                             16 << 20),
                         (3 * vmem_cap) // 8))

    weights, logits = pl.pallas_call(
        kernel,
        out_shape=(
            jax.ShapeDtypeStruct((B, NH, Tk), jnp.float32),
            jax.ShapeDtypeStruct((B, n_h, 1, OUT), jnp.float32),
        ),
        grid_spec=pltpu.PrefetchScalarGridSpec(
            num_scalar_prefetch=0,
            grid=(B, n_h, n_q),                               # Tq reduction last
            in_specs=[
                pl.BlockSpec((1, nh_tile, tq_tile, Tk),
                             lambda b, h, q: (b, h, q, 0)),   # attention (streamed)
                pl.BlockSpec((1, 1, H), lambda b, h, q: (b, 0, 0)),   # x0 row
                pl.BlockSpec((H, OUT), lambda b, h, q: (0, 0)),       # W (resident)
                pl.BlockSpec((1, OUT), lambda b, h, q: (0, 0)),       # bias (resident)
            ],
            out_specs=[
                pl.BlockSpec((1, nh_tile, Tk), lambda b, h, q: (b, h, 0)),
                pl.BlockSpec((1, 1, 1, OUT), lambda b, h, q: (b, h, 0, 0)),
            ],
        ),
        compiler_params=pltpu.CompilerParams(
            dimension_semantics=("parallel", "parallel", "arbitrary"),
            vmem_limit_bytes=vmem_limit,
        ),
    )(attn, x0_3d, w_t, bias_2d)

    return logits[:, 0, 0, :], weights


# ----------------------------------------------------------------------------
# Forward wrapper (the module's own compute on top of the MT5 backbone output)
# ----------------------------------------------------------------------------
def mt5_backup_forward(last_hidden_state, cross_attn_last, w_t, bias,
                       block_budget_bytes=None):
    """Pallas-backed equivalent of mt5_backup.forward's own compute.

    last_hidden_state: [B, S, H]        (wrapper output[0])
    cross_attn_last:   [B, NH, Tq, Tk]  (wrapper output[2][-1])
    w_t:               [H, OUT]         (nn.Linear weight, transposed)
    bias:              [OUT]
    returns (logits [B, OUT] f32, weights [B, NH, Tk] f32)
    """
    B = last_hidden_state.shape[0]
    OUT = w_t.shape[1]
    # Slice in plain JAX: only 1/S of the hidden state is ever needed, so never
    # DMA the full [B, S, H] tensor into the kernel. Keep it 3-D (B, 1, H) so
    # the VMEM block equals the full trailing dims (layout-legal).
    x0 = last_hidden_state[:, :1, :]
    logits, weights = _fused_head(cross_attn_last, x0, w_t,
                                  bias.reshape(1, OUT), block_budget_bytes)
    return logits, weights


if __name__ == "__main__":
    # Small, MT5-like shapes.
    B, S, H = 2, 8, 32          # batch, decoder seq len, hidden size
    NH, Tq, Tk = 4, 8, 8        # num heads, decoder (query) len, encoder (key) len
    OUT = 16                    # output_dim of the classification head

    key = jax.random.PRNGKey(0)
    k_hs, k_attn, k_w, k_attn2 = jax.random.split(key, 4)

    # Synthetic "wrapper" outputs standing in for the MT5 backbone.
    last_hidden_state = jax.random.normal(k_hs, (B, S, H), dtype=jnp.float32)
    attn_logits = jax.random.normal(k_attn, (B, NH, Tq, Tk), dtype=jnp.float32)
    cross_attn_last = jax.nn.softmax(attn_logits, axis=-1)  # attention-like weights

    # nn.Linear(H, OUT), bias filled with 0.0 (as in the module's __init__).
    w = jax.random.normal(k_w, (OUT, H), dtype=jnp.float32) * (1.0 / jnp.sqrt(H))
    bias = jnp.zeros((OUT,), dtype=jnp.float32)
    w_t = w.T  # [H, OUT] for the kernel

    logits, weights = mt5_backup_forward(last_hidden_state, cross_attn_last, w_t, bias)
    logits = jax.block_until_ready(logits)
    weights = jax.block_until_ready(weights)

    # Pure-JAX reference check of the same semantics.
    ref_logits = last_hidden_state[:, 0, :] @ w.T + bias
    ref_weights = cross_attn_last.mean(axis=2)
    assert logits.shape == (B, OUT) and weights.shape == (B, NH, Tk)
    assert jnp.allclose(logits, ref_logits, atol=1e-5), "logits mismatch"
    assert jnp.allclose(weights, ref_weights, atol=1e-5), "weights mismatch"

    # Also exercise the tiled Tq reduction with a masked partial last tile
    # (Tq=20, forced 2 KiB per-block budget -> tq_tile=16, n_q=2, mask on).
    Tq2 = 20
    attn2 = jax.nn.softmax(
        jax.random.normal(k_attn2, (B, NH, Tq2, Tk), dtype=jnp.float32), axis=-1)
    logits2, weights2 = mt5_backup_forward(last_hidden_state, attn2, w_t, bias,
                                           block_budget_bytes=2048)
    logits2 = jax.block_until_ready(logits2)
    weights2 = jax.block_until_ready(weights2)
    assert jnp.allclose(weights2, attn2.mean(axis=2), atol=1e-5), "masked mean mismatch"
    assert jnp.allclose(logits2, ref_logits, atol=1e-5), "masked-path logits mismatch"

    print("KERNEL_OK")
</pallas_src>

<mosaic_0001>
module attributes {stable_mosaic.version = 11 : i64} {
  func.func @_fused_kernel(%arg0: i32, %arg1: i32, %arg2: i32, %arg3: memref<1x4x8x8xf32, #tpu.memory_space<vmem>>, %arg4: memref<1x1x32xf32, #tpu.memory_space<vmem>>, %arg5: memref<32x16xf32, #tpu.memory_space<vmem>>, %arg6: memref<1x16xf32, #tpu.memory_space<vmem>>, %arg7: memref<1x4x8xf32, #tpu.memory_space<vmem>>, %arg8: memref<1x1x1x16xf32, #tpu.memory_space<vmem>>) attributes {dimension_semantics = [#tpu.dimension_semantics<parallel>, #tpu.dimension_semantics<parallel>, #tpu.dimension_semantics<arbitrary>], iteration_bounds = array<i64: 2, 1, 1>, scalar_prefetch = 0 : i64, scratch_operands = 0 : i64, tpu.core_type = #tpu.core_type<tc>, window_params = [{transform_indices = @transform_0, window_bounds = array<i64: 1, 4, 8, 8>}, {transform_indices = @transform_1, window_bounds = array<i64: 1, 1, 32>}, {pipeline_mode = #tpu.pipeline_mode<synchronous>, transform_indices = @transform_2, window_bounds = array<i64: 32, 16>}, {pipeline_mode = #tpu.pipeline_mode<synchronous>, transform_indices = @transform_3, window_bounds = array<i64: 1, 16>}, {transform_indices = @transform_4, window_bounds = array<i64: 1, 4, 8>}, {transform_indices = @transform_5, window_bounds = array<i64: 1, 1, 1, 16>}]} {
    %c0_i32 = arith.constant 0 : i32
    %0 = arith.cmpi eq, %arg2, %c0_i32 : i32
    %1 = arith.extui %0 : i1 to i32
    %c0_i32_0 = arith.constant 0 : i32
    %2 = arith.cmpi ne, %1, %c0_i32_0 : i32
    scf.if %2 {
      %cst_12 = arith.constant 0.000000e+00 : f32
      %13 = vector.broadcast %cst_12 : f32 to vector<1x4x8xf32>
      %c0_13 = arith.constant 0 : index
      %c0_14 = arith.constant 0 : index
      %c0_15 = arith.constant 0 : index
      %14 = vector.load %arg7[%c0_13, %c0_14, %c0_15] : memref<1x4x8xf32, #tpu.memory_space<vmem>>, vector<1x4x8xf32>
      tpu.vector_store %arg7[%c0_13, %c0_14, %c0_15], %13 {strides = array<i32>} : memref<1x4x8xf32, #tpu.memory_space<vmem>>, vector<1x4x8xf32>,
      %c0_16 = arith.constant 0 : index
      %c0_17 = arith.constant 0 : index
      %c0_18 = arith.constant 0 : index
      %15 = vector.load %arg4[%c0_16, %c0_17, %c0_18] : memref<1x1x32xf32, #tpu.memory_space<vmem>>, vector<1x1x32xf32>
      %16 = vector.shape_cast %15 : vector<1x1x32xf32> to vector<1x32xf32>
      %c0_19 = arith.constant 0 : index
      %c0_20 = arith.constant 0 : index
      %17 = vector.load %arg5[%c0_19, %c0_20] : memref<32x16xf32, #tpu.memory_space<vmem>>, vector<32x16xf32>
      %cst_21 = arith.constant dense<0.000000e+00> : vector<1x16xf32>
      %18 = tpu.matmul %16, %17, %cst_21 {dimension_numbers = #tpu.dot_dimension_numbers<[1], [0], [0], [1], [0, 0, 1, 1], [], []>} : vector<1x32xf32>, vector<32x16xf32>, vector<1x16xf32> -> vector<1x16xf32>
      %c0_22 = arith.constant 0 : index
      %c0_23 = arith.constant 0 : index
      %19 = vector.load %arg6[%c0_22, %c0_23] : memref<1x16xf32, #tpu.memory_space<vmem>>, vector<1x16xf32>
      %20 = arith.addf %18, %19 : vector<1x16xf32>
      %c0_24 = arith.constant 0 : index
      %c0_25 = arith.constant 0 : index
      %c0_26 = arith.constant 0 : index
      %c0_27 = arith.constant 0 : index
      %21 = vector.load %arg8[%c0_24, %c0_25, %c0_26, %c0_27] : memref<1x1x1x16xf32, #tpu.memory_space<vmem>>, vector<1x1x1x16xf32>
      %22 = vector.shape_cast %21 : vector<1x1x1x16xf32> to vector<1x16xf32>
      %23 = vector.shape_cast %20 : vector<1x16xf32> to vector<1x1x1x16xf32>
      tpu.vector_store %arg8[%c0_24, %c0_25, %c0_26, %c0_27], %23 {strides = array<i32>} : memref<1x1x1x16xf32, #tpu.memory_space<vmem>>, vector<1x1x1x16xf32>,
    } else {
    }
    %c0 = arith.constant 0 : index
    %c0_1 = arith.constant 0 : index
    %c0_2 = arith.constant 0 : index
    %c0_3 = arith.constant 0 : index
    %3 = vector.load %arg3[%c0, %c0_1, %c0_2, %c0_3] : memref<1x4x8x8xf32, #tpu.memory_space<vmem>>, vector<1x4x8x8xf32>
    %4 = vector.shape_cast %3 : vector<1x4x8x8xf32> to vector<4x8x8xf32>
    %c0_4 = arith.constant 0 : index
    %c0_5 = arith.constant 0 : index
    %c0_6 = arith.constant 0 : index
    %5 = vector.load %arg7[%c0_4, %c0_5, %c0_6] : memref<1x4x8xf32, #tpu.memory_space<vmem>>, vector<1x4x8xf32>
    %cst = arith.constant dense<0.000000e+00> : vector<4x8xf32>
    %6 = vector.multi_reduction <add>, %4, %cst [1] : vector<4x8x8xf32> to vector<4x8xf32>
    %7 = vector.shape_cast %6 : vector<4x8xf32> to vector<1x4x8xf32>
    %8 = arith.addf %5, %7 : vector<1x4x8xf32>
    %c0_7 = arith.constant 0 : index
    %c0_8 = arith.constant 0 : index
    %c0_9 = arith.constant 0 : index
    %9 = vector.load %arg7[%c0_7, %c0_8, %c0_9] : memref<1x4x8xf32, #tpu.memory_space<vmem>>, vector<1x4x8xf32>
    tpu.vector_store %arg7[%c0_7, %c0_8, %c0_9], %8 {strides = array<i32>} : memref<1x4x8xf32, #tpu.memory_space<vmem>>, vector<1x4x8xf32>,
    %c0_i32_10 = arith.constant 0 : i32
    %10 = arith.cmpi eq, %arg2, %c0_i32_10 : i32
    %11 = arith.extui %10 : i1 to i32
    %c0_i32_11 = arith.constant 0 : i32
    %12 = arith.cmpi ne, %11, %c0_i32_11 : i32
    scf.if %12 {
      %c0_12 = arith.constant 0 : index
      %c0_13 = arith.constant 0 : index
      %c0_14 = arith.constant 0 : index
      %13 = vector.load %arg7[%c0_12, %c0_13, %c0_14] : memref<1x4x8xf32, #tpu.memory_space<vmem>>, vector<1x4x8xf32>
      %cst_15 = arith.constant 1.250000e-01 : f32
      %14 = vector.broadcast %cst_15 : f32 to vector<1x4x8xf32>
      %15 = arith.mulf %13, %14 : vector<1x4x8xf32>
      %c0_16 = arith.constant 0 : index
      %c0_17 = arith.constant 0 : index
      %c0_18 = arith.constant 0 : index
      %16 = vector.load %arg7[%c0_16, %c0_17, %c0_18] : memref<1x4x8xf32, #tpu.memory_space<vmem>>, vector<1x4x8xf32>
      tpu.vector_store %arg7[%c0_16, %c0_17, %c0_18], %15 {strides = array<i32>} : memref<1x4x8xf32, #tpu.memory_space<vmem>>, vector<1x4x8xf32>,
    } else {
    }
    return
  }
  func.func @transform_0(%arg0: i32, %arg1: i32, %arg2: i32) -> (i32, i32, i32, i32) {
    %c0_i32 = arith.constant 0 : i32
    %c0_i32_0 = arith.constant 0 : i32
    return %arg0, %arg1, %arg2, %c0_i32 : i32, i32, i32, i32
  }
  func.func @transform_1(%arg0: i32, %arg1: i32, %arg2: i32) -> (i32, i32, i32) {
    %c0_i32 = arith.constant 0 : i32
    %c0_i32_0 = arith.constant 0 : i32
    %c0_i32_1 = arith.constant 0 : i32
    return %arg0, %c0_i32, %c0_i32_0 : i32, i32, i32
  }
  func.func @transform_2(%arg0: i32, %arg1: i32, %arg2: i32) -> (i32, i32) {
    %c0_i32 = arith.constant 0 : i32
    %c0_i32_0 = arith.constant 0 : i32
    %c0_i32_1 = arith.constant 0 : i32
    return %c0_i32, %c0_i32_0 : i32, i32
  }
  func.func @transform_3(%arg0: i32, %arg1: i32, %arg2: i32) -> (i32, i32) {
    %c0_i32 = arith.constant 0 : i32
    %c0_i32_0 = arith.constant 0 : i32
    %c0_i32_1 = arith.constant 0 : i32
    return %c0_i32, %c0_i32_0 : i32, i32
  }
  func.func @transform_4(%arg0: i32, %arg1: i32, %arg2: i32) -> (i32, i32, i32) {
    %c0_i32 = arith.constant 0 : i32
    %c0_i32_0 = arith.constant 0 : i32
    return %arg0, %arg1, %c0_i32 : i32, i32, i32
  }
  func.func @transform_5(%arg0: i32, %arg1: i32, %arg2: i32) -> (i32, i32, i32, i32) {
    %c0_i32 = arith.constant 0 : i32
    %c0_i32_0 = arith.constant 0 : i32
    %c0_i32_1 = arith.constant 0 : i32
    return %arg0, %arg1, %c0_i32, %c0_i32_0 : i32, i32, i32, i32
  }
}

</mosaic_0001>

<bundles_post_ra>
// kernel: tpu_custom_call.1
= control target key start
LH: loop header
LB: loop body
LE: loop exit
PB: predicated region body
PF: predicated region fallthrough
CT: control target
= control target key end

     0   :  { %11 = vsyncpa [#allocation3], 0  ;;  %s1058_s0 = inlined_call_operand.hbm [shape: f32[2,4,8,8], index: 0, kind: input, shape index: {}]   ;;  %s1059_s1 = inlined_call_operand.vmem [shape: f32[2,1,32], index: 1, kind: input, shape index: {}]   ;;  %s1060_s2 = inlined_call_operand.vmem [shape: f32[32,16], index: 2, kind: input, shape index: {}]   ;;  %s1061_s3 = inlined_call_operand.vmem [shape: f32[1,16], index: 3, kind: input, shape index: {}]   ;;  %s1062_s4 = inlined_call_operand.hbm [shape: f32[2,4,8], index: 4, kind: output, shape index: {0}]   ;;  %s1063_s5 = inlined_call_operand.hbm [shape: f32[2,1,1,16], index: 5, kind: output, shape index: {1}]  }
   0x1   :  { %13 = vsyncpa [#allocation3 + $0x1], 0 }
   0x2   :  { %14 = vsyncpa [#allocation4], 0 }
   0x3   :  { %16 = vsyncpa [#allocation4 + $0x1], 0 }
   0x4   :  { %17 = vsyncpa [#allocation7], 0 }
   0x5   :  { %19 = vsyncpa [#allocation7 + $0x1], 0  ;;  %s878_s18 = smov 0   ;;  %s880_s19 = smov 0  }
   0x6   :  { %s882_s20 = smov 0   ;;  %s884_s21 = smov 0  }
   0x7   :  { %s886_s22 = smov 0   ;;  %s888_s23 = smov 0  }
   0x8 LB: > { %s597_s24 = sadd.s32 4294967295, %s839_s23   ;;  %s598_s25 = sadd.s32 4294967294, %s839_s23   ;;  %s839_s23 = sphi %s888_s23, %s25_s23   ;;  %s835_s22 = sphi %s886_s22, %s1074_s22   ;;  %s831_s21 = sphi %s884_s21, %s1073_s21   ;;  %s827_s20 = sphi %s882_s20, %s1072_s20   ;;  %s823_s19 = sphi %s880_s19, %s1071_s19   ;;  %s819_s18 = sphi %s878_s18, %s1070_s18  }
   0x9   : > { %s44_s26 = sadd.s32 1, %s835_s22  ;;  %s55_s27 = sadd.s32 1, %s827_s20 }
   0xa   : > { %p46_p0 = scmp.ge.s32.totalorder %s44_s26, 2  ;;  %p62_p1 = scmp.ne.s32.totalorder %s827_s20, %s823_s19 }
   0xb   : > { %p63_p2 = scmp.eq.s32.totalorder %s839_s23, 0  ;;  %p68_p3 = scmp.ne.s32.totalorder %s823_s19, %s819_s18 }
   0xc   : > { %s1076_s26 = smov (%p46_p0, %s44_s26), 0  ;;  %p69_p5 = scmp.eq.s32.totalorder %s597_s24, 0 }
   0xd   : > { %p919_p4 = por %p63_p2, %p62_p1  ;;  %s48_s29 = ssub.s32 %s835_s22, %s1076_s26 }
   0xe   : > { %p162_p6 = scmp.eq.s32.totalorder %s597_s24, 1  ;;  %p53_p7 = scmp.eq.s32.totalorder %s48_s29, 0 }
   0xf   : > { %p925_p8 = por %p69_p5, %p68_p3  ;;  %p168_p10 = scmp.eq.s32.totalorder %s598_s25, 1 }
  0x10   : > { %p929_p9 = por %p162_p6, %p62_p1  ;;  %p647_p13 = scmp.lt.s32.totalorder %s839_s23, 2 }
  0x11   : > { %s934_s7 = scalar_select %p53_p7, %s827_s20, %s55_s27  }
  0x12   : > { %p936_p11 = por %p168_p10, %p68_p3  ;;  %s222_s9 = sand.u32 1, %s827_s20  }
  0x13   : > { %s601_s10 = sshll.u32 %s222_s9, 5  ;;  %s613_s11 = sshll.u32 %s835_s22, 9 }
  0x14   : > { %s235_s14 = scalar_lea.hbm %s1058_s0, %s613_s11  ;;  %s226_s15 = scalar_lea.vmem [#allocation2], %s601_s10 }
  0x15   : > { %s236_s16 = sshll.u32 %s226_s15, 4  ;;  %p949_p0 = pnand %p647_p13, %p919_p4  ;;  %s237_s16 = int_to_ptr.vmem [resolvable:$true] %s236_s16 }
  0x16   : > { %p604_p1 = scmp.ge.s32.totalorder %s839_s23, 1  ;;  %s223_s24 = scalar_lea.sflag [#allocation3], %s222_s9 }
  0x17   : > { %p703_p2 = pneg %p949_p0  ;;  %s714_s25 = scalar_lea.vmem %s237_s16, 512 }
  0x18   : > { %p715_p3 = scmp.ne.s32.totalorder %s237_s16, %s714_s25  ;;  %s841_s27 = smov [#allocation2]  }
  0x19   : > { %s719_s29 = sshll.u32 %s841_s27, 4  ;;  %s720_s29 = int_to_ptr.vmem [resolvable:$false] %s719_s29 }
  0x1a   : > { %p717_p5 = pnand %p715_p3, %p703_p2  ;;  %s721_s10 = scalar_lea.vmem %s720_s29, 1024 }
  0x1b   : > { %p722_p7 = scmp.lt.s32.totalorder %s237_s16, %s720_s29  ;;  %p723_p10 = scmp.lt.s32.totalorder %s721_s10, %s714_s25 }
  0x1c   : > { %p718_p6 = pneg %p717_p5 }
  0x1d   : > { %p724_p12 = por %p723_p10, %p722_p7 }
  0x1f   : > { %p725_p4 = pnand %p724_p12, %p718_p6 }
  0x21   : > { %728 = shalt.err (!%p725_p4)
}
  0x22   : > { %s842_s28 = smov 128   ;;  %s843_s9 = smov 8  }
  0x23   : > { %639 = dma.hbm_to_vmem [thread:$0]  (!%p949_p0), %s235_s14, 512, %s237_s16, %s223_s24, %s842_s28, %s842_s28, %s843_s9  }
  0x24   : > { %p250_p13 = scmp.lt.s32.totalorder %s839_s23, 3 }
  0x26   : > { %p251_p2 = pnand %p604_p1, %p250_p13 }
  0x27   : > { %s962_s11 = sand.u32 (!%p251_p2), 1, %s823_s19  }
  0x28   : > { %254 = sbr.rel (%p251_p2) target bundleno = 263 (0x107), region = 36  ;;  %s605_s12 = sshll.u32 (!%p251_p2), %s962_s11, 5 }
  0x29   : > { %s257_s13 = scalar_lea.sflag (!%p251_p2), [#allocation3], %s962_s11  ;;  %s260_s15 = scalar_lea.vmem (!%p251_p2), [#allocation2], %s605_s12 }
  0x2d   : > { %806 = dma.done.wait (%p925_p8), %s257_s13, 512  }
  0x2e   : > { %808 = vsyncadd (%p925_p8), %s257_s13, 4294966784  ;;  %v844_v0 = vmov 0.0   ;;  %vm845_vm0 = vmmov 0   ;;  %p295_p12 = scmp.lt.s32.totalorder %s831_s21, 1  ;;  %v308_v1 = vld [vmem:[%s1060_s2 + $0x18] sm:$0xff]  ;;  %v307_v2 = vld [vmem:[%s1060_s2 + $0x10] sm:$0xff] }
  0x2f   : > { %619 = vmatprep.subr.mxu0 %v844_v0  ;;  %627 = vmatprep.mubr.msk.f32.mxu0 %vm845_vm0, %v844_v0  ;;  %v306_v3 = vld [vmem:[%s1060_s2 + $0x8] sm:$0xff]  ;;  %v305_v4 = vld [vmem:[%s1060_s2] sm:$0xff]  ;;  %vm310_vm1 = vcmask 261120   ;;  %vm391_vm2 = vcmask 64512   ;;  %v388_v8 = vld [vmem:[%s260_s15 + $0x10] sm:$0xff]  ;;  %s606_s13 = sshll.u32 %s962_s11, 2 }
  0x30   : > { %s296_s14 = scalar_select %p295_p12, %s831_s21, 1  ;;  %620 = vmatpush3.msra.mxu0 %v308_v1  ;;  %v386_v6 = vld [vmem:[%s260_s15] sm:$0xff]  ;;  %v387_v7 = vld [vmem:[%s260_s15 + $0x8] sm:$0xff]  ;;  %v389_v11 = vld [vmem:[%s260_s15 + $0x18] sm:$0xff]  ;;  %v406_v14 = vsel %vm391_vm2, %v388_v8, 0.0  ;;  %vm302_vm3 = vcmask 60416  }
  0x31   : > { %621 = vmatprep.subr.mxu0 %v844_v0  ;;  %v392_v9 = vsel %vm391_vm2, %v386_v6, 0.0  ;;  %v399_v10 = vsel %vm391_vm2, %v387_v7, 0.0  ;;  %v407_v15 = vrot.slane %v406_v14, 4  ;;  %v413_v16 = vsel %vm391_vm2, %v389_v11, 0.0  ;;  %s609_s15 = sshll.u32 %s831_s21, 6  ;;  %s441_s30 = scalar_lea.sflag [#allocation4], %s962_s11 }
  0x32   : > { %s297_s28 = scalar_lea.vmem %s1059_s1, %s296_s14  ;;  %622 = vmatpush3.msra.mxu0 %v307_v2  ;;  %v393_v12 = vrot.slane %v392_v9, 4  ;;  %v400_v13 = vrot.slane %v399_v10, 4  ;;  %v414_v19 = vrot.slane %v413_v16, 4  ;;  %s287_s14 = scalar_lea.vmem [#allocation5], %s606_s13  ;;  %vm424_vm4 = vcmask 1041409  }
  0x33   : > { %623 = vmatprep.subr.mxu0 %v844_v0  ;;  %v304_v5 = vld [vmem:[%s297_s28] sm:$0x1]  ;;  %v408_v20 = vadd.f32 %v407_v15, %v406_v14  ;;  %303 = vst.msk [vmem:[%s287_s14] sm:$0xf] %vm302_vm3, %v844_v0  ;;  %vm426_vm5 = vcmask 1042434   ;;  %vm428_vm6 = vcmask 1043459   ;;  %s457_s24 = scalar_lea.hbm %s1062_s4, %s609_s15 }
  0x34   : > { %624 = vmatpush3.msra.mxu0 %v306_v3  ;;  %v394_v17 = vadd.f32 %v393_v12, %v392_v9  ;;  %v401_v18 = vadd.f32 %v400_v13, %v399_v10  ;;  %v415_v23 = vadd.f32 %v414_v19, %v413_v16  ;;  %s459_s25 = sshll.u32 %s287_s14, 4  ;;  %s846_s29 = smov [#allocation5]   ;;  %s460_s25 = int_to_ptr.vmem [resolvable:$true] %s459_s25 }
  0x35   : > { %625 = vmatprep.subr.mxu0 %v844_v0  ;;  %v409_v24 = vrot.slane %v408_v20, 2  ;;  %s729_s27 = scalar_lea.vmem %s460_s25, 64  ;;  %s733_s10 = sshll.u32 %s846_s29, 4  ;;  %s734_s10 = int_to_ptr.vmem [resolvable:$false] %s733_s10 }
  0x36   : > { %626 = vmatpush3.msra.mxu0 %v305_v4  ;;  %v395_v21 = vrot.slane %v394_v17, 2  ;;  %v402_v22 = vrot.slane %v401_v18, 2  ;;  %v416_v27 = vrot.slane %v415_v23, 2  ;;  %p730_p8 = scmp.ne.s32.totalorder %s460_s25, %s729_s27  ;;  %s735_s28 = scalar_lea.vmem %s734_s10, 128 }
  0x37   : > { %628 = vmatmul.mubr.msk.f32.vlgmr.msra.gmra.mxu0 %vm310_vm1, %v304_v5  ;;  %v410_v28 = vadd.f32 %v409_v24, %v408_v20  ;;  %p736_p3 = scmp.lt.s32.totalorder %s460_s25, %s734_s10  ;;  %p737_p5 = scmp.lt.s32.totalorder %s735_s28, %s729_s27 }
  0x38   : > { %v396_v25 = vadd.f32 %v395_v21, %v394_v17  ;;  %v403_v26 = vadd.f32 %v402_v22, %v401_v18  ;;  %v417_v31 = vadd.f32 %v416_v27, %v415_v23  ;;  %p731_p0 = pnand %p730_p8, %p929_p9 }
  0x39   : > { %v411_v32 = vrot.slane %v410_v28, 1  ;;  %p738_p6 = por %p737_p5, %p736_p3 }
  0x3a   : > { %v397_v29 = vrot.slane %v396_v25, 1  ;;  %v404_v30 = vrot.slane %v403_v26, 1  ;;  %v418_v35 = vrot.slane %v417_v31, 1  ;;  %v390_v40 = vld [vmem:[%s287_s14] sm:$0xf]  ;;  %p732_p1 = pneg %p731_p0 }
  0x3b   : > { %v412_v36 = vadd.f32 %v411_v32, %v410_v28 }
  0x3c   : > { %v398_v33 = vadd.f32 %v397_v29, %v396_v25  ;;  %v405_v34 = vadd.f32 %v404_v30, %v403_v26  ;;  %v419_v37 = vadd.f32 %v418_v35, %v417_v31  ;;  %p739_p7 = pnand %p738_p6, %p732_p1 }
  0x3e   : > { %v425_v38 = vsel %vm424_vm4, %v405_v34, %v398_v33 }
  0x3f   : > { %v427_v39 = vsel %vm426_vm5, %v412_v36, %v425_v38 }
  0x40   : > { %v429_v41 = vsel %vm428_vm6, %v419_v37, %v427_v39 }
  0x41   : > { %v431_v42 = vadd.f32 %v429_v41, %v390_v40 }
  0x43   : > { %433 = vst.msk [vmem:[%s287_s14] sm:$0xf] %vm302_vm3, %v431_v42 }
  0x4a   : > { %v437_v43 = vld [vmem:[%s287_s14] sm:$0xf] }
  0x4b   : > { %v438_v44 = vmul.f32 0.125, %v437_v43 }
  0x4d   : > { %439 = vst.msk [vmem:[%s287_s14] sm:$0xf] %vm302_vm3, %v438_v44 }
  0x4e   : > { %742 = shalt.err (!%p739_p7)
}
  0x4f   : > { %s743_s9 = scalar_lea.hbm %s457_s24, 64  ;;  %s747_s14 = scalar_lea.hbm %s1062_s4, 128 }
  0x50   : > { %p744_p10 = scmp.ne.s32.totalorder %s457_s24, %s743_s9  ;;  %p748_p2 = scmp.lt.s32.totalorder %s457_s24, %s1062_s4 }
  0x51   : > { %p749_p12 = scmp.lt.s32.totalorder %s747_s14, %s743_s9 }
  0x52   : > { %p745_p4 = pnand %p744_p10, %p929_p9 }
  0x53   : > { %p750_p8 = por %p749_p12, %p748_p2 }
  0x54   : > { %p746_p13 = pneg %p745_p4 }
  0x56   : > { %p751_p0 = pnand %p750_p8, %p746_p13 }
  0x58   : > { %754 = shalt.err (!%p751_p0)
}
  0x59   : > { %632 = dma.vmem_to_hbm [thread:$0]  (%p929_p9), %s460_s25, 64, %s457_s24, %s441_s30   ;;  %v309_v45 = vld [vmem:[%s1061_s3] sm:$0x1]  ;;  %vm384_vm7 = vcmask 122880  }
  0x5a   : > { %s610_s29 = sshll.u32 %s831_s21, 4  ;;  %s293_s10 = scalar_lea.vmem [#allocation6], %s962_s11 }
  0x5b   : > { %s473_s28 = sshll.u32 %s293_s10, 4  ;;  %s1016_s13 = scalar_lea.hbm %s1063_s5, %s610_s29  ;;  %s474_s28 = int_to_ptr.vmem [resolvable:$true] %s473_s28 }
  0x5c   : > { %s446_s14 = scalar_lea.sflag [#allocation7], %s962_s11  ;;  %s755_s24 = scalar_lea.vmem %s474_s28, 16 }
  0x5d   : > { %p756_p1 = scmp.ne.s32.totalorder %s474_s28, %s755_s24  ;;  %s847_s21 = smov [#allocation6]  }
  0x5e   : > { %s759_s25 = sshll.u32 %s847_s21, 4  ;;  %s760_s25 = int_to_ptr.vmem [resolvable:$false] %s759_s25 }
  0x5f   : > { %p757_p3 = pnand %p756_p1, %p929_p9  ;;  %s761_s30 = scalar_lea.vmem %s760_s25, 32 }
  0x60   : > { %p762_p6 = scmp.lt.s32.totalorder %s474_s28, %s760_s25  ;;  %p763_p7 = scmp.lt.s32.totalorder %s761_s30, %s755_s24 }
  0x61   : > { %p758_p5 = pneg %p757_p3 }
  0x62   : > { %p764_p10 = por %p763_p7, %p762_p6 }
  0x64   : > { %p765_p4 = pnand %p764_p10, %p758_p5 }
  0xf7   : > { %v380_v46 = vpop.f32.mrf.mxu0 }
  0xf8   : > { %v381_v47 = vadd.f32 %v380_v46, %v309_v45 }
  0xf9   : > { %v629_v48 = vpop.f32.mrf.mxu0 }
  0xfa   : > { %385 = vst.msk [vmem:[%s293_s10] sm:$0x1] %vm384_vm7, %v381_v47 }
  0xfb   : > { %768 = shalt.err (!%p765_p4)
}
  0xfc   : > { %s769_s15 = scalar_lea.hbm %s1016_s13, 16  ;;  %s773_s17 = scalar_lea.hbm %s1063_s5, 32 }
  0xfd   : > { %p770_p13 = scmp.ne.s32.totalorder %s1016_s13, %s769_s15  ;;  %p774_p8 = scmp.lt.s32.totalorder %s1016_s13, %s1063_s5 }
  0xfe   : > { %p775_p0 = scmp.lt.s32.totalorder %s773_s17, %s769_s15 }
  0xff   : > { %p771_p2 = pnand %p770_p13, %p929_p9 }
 0x100   : > { %p776_p1 = por %p775_p0, %p774_p8 }
 0x101   : > { %p772_p12 = pneg %p771_p2 }
 0x103   : > { %p777_p3 = pnand %p776_p1, %p772_p12 }
 0x105   : > { %780 = shalt.err (!%p777_p3)
}
 0x106   : > { %633 = dma.vmem_to_hbm [thread:$0]  (%p929_p9), %s474_s28, 16, %s1016_s13, %s446_s14  }
 0x107 PF: > { %s485_s10 = sand.u32 1, %s819_s18   ;;  %p1069_p5 = scmp.ge.s32.totalorder %s839_s23, 2 }
 0x108   : > { %s486_s9 = scalar_lea.sflag [#allocation4], %s485_s10 }
 0x109   : > { %p641_p6 = pnand %p1069_p5, %p936_p11 }
 0x10b   : > { %p642_p7 = pneg %p641_p6 }
 0x10d   : > { %810 = dma.done.wait (%p642_p7), %s486_s9, 64  }
 0x10e   : > { %812 = vsyncadd (%p642_p7), %s486_s9, 4294967232  ;;  %s495_s12 = scalar_lea.sflag [#allocation7], %s485_s10 }
 0x10f   : > { %814 = dma.done.wait (%p642_p7), %s495_s12, 16  }
 0x110   : > { %816 = vsyncadd (%p642_p7), %s495_s12, 4294967280  ;;  %s25_s23 = sadd.s32 1, %s839_s23   ;;  %s1070_s18 = smov %s823_s19 }
 0x111   : > { %p22_p10 = scmp.ge.s32.totalorder %s25_s23, 4   ;;  %s1071_s19 = smov %s827_s20 }
 0x112   : > { %s1072_s20 = smov %s934_s7  ;;  %s1073_s21 = smov %s835_s22 }
 0x113   : > { %s1074_s22 = smov %s1076_s26  ;;  %24 = sbr.rel (!%p22_p10) target bundleno = 8 (0x8), region = 109 }
 0x118   :  { %499 = vsyncpa [#allocation3], 1 }
 0x119   :  { %501 = vsyncpa [#allocation3 + $0x1], 1 }
 0x11a   :  { %502 = vsyncpa [#allocation4], 1 }
 0x11b   :  { %504 = vsyncpa [#allocation4 + $0x1], 1 }
 0x11c   :  { %505 = vsyncpa [#allocation7], 1 }
 0x11d   :  { %507 = vsyncpa [#allocation7 + $0x1], 1 }

</bundles_post_ra>
